<compile_context>
chip_gen: v5e
topology: v5e:2x2
jax: 0.10.0
libtpu: 0.0.40
codegen_flags: <defaults>
</compile_context>

<pallas_src>
import functools

import jax
import jax.numpy as jnp
import numpy as np
from jax.experimental import pallas as pl
from jax.experimental.pallas import tpu as pltpu

EPS = 1e-5        # PyTorch BatchNorm2d default
LANE = 128
SUBLANE = 8
ROW_ALIGN = 16    # keep row tiles multiples of 16 (bf16 sublane packing)


def _round_up(x, m):
    return (x + m - 1) // m * m


# -----------------------------------------------------------------------------
# Pass 1: tiled bf16 MXU matmul + per-tile per-channel sum / sum-of-squares rows
# -----------------------------------------------------------------------------
def _matmul_stats_kernel(a_ref, w_ref, y_ref, sum_ref, ssq_ref):
    # bf16 x bf16 -> f32 on the MXU.
    y = jnp.dot(a_ref[...], w_ref[...], preferred_element_type=jnp.float32)
    y_ref[...] = y.astype(y_ref.dtype)
    # Per-tile partial per-channel reductions.  Each grid step writes its OWN
    # (8, Cp) stats block -> no revisited accumulator -> the M axis can be
    # "parallel" (megacore-sharded on v7x).  Padded rows of A and padded columns
    # of W are zero and there is no conv bias, so padding contributes exactly 0
    # to the sums -- no masking required.
    psum = jnp.sum(y, axis=0, keepdims=True)
    pssq = jnp.sum(y * y, axis=0, keepdims=True)
    sum_ref[...] = jnp.broadcast_to(psum, sum_ref.shape)
    ssq_ref[...] = jnp.broadcast_to(pssq, ssq_ref.shape)


def conv_stats(patches, w2d, tm):
    """patches: (Mp, Kp) bf16, w2d: (Kp, Cp) bf16 -> (y bf16, sum (1,Cp), ssq (1,Cp))."""
    mp, kp = patches.shape
    cp = w2d.shape[1]
    nt = mp // tm
    y, s, ss = pl.pallas_call(
        _matmul_stats_kernel,
        out_shape=(jax.ShapeDtypeStruct((mp, cp), jnp.bfloat16),
                   jax.ShapeDtypeStruct((nt * SUBLANE, cp), jnp.float32),
                   jax.ShapeDtypeStruct((nt * SUBLANE, cp), jnp.float32)),
        grid=(nt,),
        in_specs=[pl.BlockSpec((tm, kp), lambda i: (i, 0)),
                  pl.BlockSpec((kp, cp), lambda i: (0, 0))],
        out_specs=(pl.BlockSpec((tm, cp), lambda i: (i, 0)),
                   pl.BlockSpec((SUBLANE, cp), lambda i: (i, 0)),
                   pl.BlockSpec((SUBLANE, cp), lambda i: (i, 0))),
        compiler_params=pltpu.CompilerParams(
            dimension_semantics=("parallel",)),
    )(patches, w2d)
    # Tiny O(tiles*C) reduction of the per-tile partials (each block holds its
    # row replicated across 8 sublanes -> take every 8th row).
    s = jnp.sum(s[::SUBLANE], axis=0, keepdims=True)
    ss = jnp.sum(ss[::SUBLANE], axis=0, keepdims=True)
    return y, s, ss


# -----------------------------------------------------------------------------
# Pass 2: fused folded-BN FMA (+ residual) (+ ReLU), tiled over M ("parallel")
# -----------------------------------------------------------------------------
def _bn_act_kernel(y_ref, sc_ref, sh_ref, o_ref, *, relu):
    y = y_ref[...].astype(jnp.float32) * sc_ref[...] + sh_ref[...]
    if relu:
        y = jnp.maximum(y, 0.0)
    o_ref[...] = y.astype(o_ref.dtype)


def _bn_add_relu_kernel(y_ref, sc_ref, sh_ref, r_ref, rsc_ref, rsh_ref, o_ref):
    y = y_ref[...].astype(jnp.float32) * sc_ref[...] + sh_ref[...]
    r = r_ref[...].astype(jnp.float32) * rsc_ref[...] + rsh_ref[...]
    o_ref[...] = jnp.maximum(y + r, 0.0)


def _bn_add_identity_relu_kernel(y_ref, sc_ref, sh_ref, r_ref, o_ref):
    # Identity residual: skip the scale/shift FMA on the residual operand.
    y = y_ref[...].astype(jnp.float32) * sc_ref[...] + sh_ref[...]
    o_ref[...] = jnp.maximum(y + r_ref[...].astype(jnp.float32), 0.0)


def bn_act(y, scale, shift, tm, *, relu, out_dtype):
    mp, cp = y.shape
    return pl.pallas_call(
        functools.partial(_bn_act_kernel, relu=relu),
        out_shape=jax.ShapeDtypeStruct((mp, cp), out_dtype),
        grid=(mp // tm,),
        in_specs=[pl.BlockSpec((tm, cp), lambda i: (i, 0)),
                  pl.BlockSpec((1, cp), lambda i: (0, 0)),
                  pl.BlockSpec((1, cp), lambda i: (0, 0))],
        out_specs=pl.BlockSpec((tm, cp), lambda i: (i, 0)),
        compiler_params=pltpu.CompilerParams(dimension_semantics=("parallel",)),
    )(y, scale, shift)


def bn_add_relu(y, scale, shift, r, rscale, rshift, tm):
    mp, cp = y.shape
    return pl.pallas_call(
        _bn_add_relu_kernel,
        out_shape=jax.ShapeDtypeStruct((mp, cp), jnp.float32),
        grid=(mp // tm,),
        in_specs=[pl.BlockSpec((tm, cp), lambda i: (i, 0)),
                  pl.BlockSpec((1, cp), lambda i: (0, 0)),
                  pl.BlockSpec((1, cp), lambda i: (0, 0)),
                  pl.BlockSpec((tm, cp), lambda i: (i, 0)),
                  pl.BlockSpec((1, cp), lambda i: (0, 0)),
                  pl.BlockSpec((1, cp), lambda i: (0, 0))],
        out_specs=pl.BlockSpec((tm, cp), lambda i: (i, 0)),
        compiler_params=pltpu.CompilerParams(dimension_semantics=("parallel",)),
    )(y, scale, shift, r, rscale, rshift)


def bn_add_identity_relu(y, scale, shift, r, tm):
    mp, cp = y.shape
    return pl.pallas_call(
        _bn_add_identity_relu_kernel,
        out_shape=jax.ShapeDtypeStruct((mp, cp), jnp.float32),
        grid=(mp // tm,),
        in_specs=[pl.BlockSpec((tm, cp), lambda i: (i, 0)),
                  pl.BlockSpec((1, cp), lambda i: (0, 0)),
                  pl.BlockSpec((1, cp), lambda i: (0, 0)),
                  pl.BlockSpec((tm, cp), lambda i: (i, 0))],
        out_specs=pl.BlockSpec((tm, cp), lambda i: (i, 0)),
        compiler_params=pltpu.CompilerParams(dimension_semantics=("parallel",)),
    )(y, scale, shift, r)


# -----------------------------------------------------------------------------
# Glue: im2col, padding helpers, BN finalize, tile selection
# -----------------------------------------------------------------------------
def im2col(x_nhwc, ksize, stride, pad):
    n, h, w, c = x_nhwc.shape
    xp = jnp.pad(x_nhwc, ((0, 0), (pad, pad), (pad, pad), (0, 0)))
    ho = (h + 2 * pad - ksize) // stride + 1
    wo = (w + 2 * pad - ksize) // stride + 1
    taps = []
    for kh in range(ksize):
        for kw in range(ksize):
            taps.append(xp[:, kh:kh + stride * ho:stride, kw:kw + stride * wo:stride, :])
    p = jnp.stack(taps, axis=3)                       # (N, Ho, Wo, k*k, C)
    return p.reshape(n * ho * wo, ksize * ksize * c), (n, ho, wo)


def _w2d(w):  # PyTorch conv weight (Cout, Cin, kh, kw) -> (kh*kw*Cin, Cout)
    return jnp.transpose(w, (2, 3, 1, 0)).reshape(-1, w.shape[0])


def _pad2(x, rows, cols, dtype):
    r, c = x.shape
    return jnp.pad(x.astype(dtype), ((0, rows - r), (0, cols - c)))


def _pad_vec(v, cols):
    return jnp.pad(v.astype(jnp.float32), (0, cols - v.shape[0])).reshape(1, cols)


def _bn_scale_shift(s, ss, gamma_pad, beta_pad, m):
    # Tiny O(C) finalize of the accumulated statistics; folded BN affine.
    mean = s / m
    var = jnp.maximum(ss / m - mean * mean, 0.0)
    scale = gamma_pad * jax.lax.rsqrt(var + EPS)
    shift = beta_pad - mean * scale
    return scale, shift


def _pick_tm_matmul(m, kp, cp, tm_max, budget_bytes):
    """Largest row tile (multiple of 16) whose pass-1 working set (double-buffered
    bf16 A + W + double-buffered bf16 y) fits the VMEM budget."""
    tm = min(_round_up(tm_max, ROW_ALIGN), _round_up(m, ROW_ALIGN))
    while tm > ROW_ALIGN:
        working = 2 * tm * kp * 2 + 2 * kp * cp * 2 + 2 * tm * cp * 2
        if working <= budget_bytes:
            break
        tm = max(ROW_ALIGN, (tm // 2) // ROW_ALIGN * ROW_ALIGN)
    return tm


def _pick_tm_elementwise(mp, tm, cap):
    """Largest multiple of tm that divides mp and is <= cap.  Pass 2 is pure
    HBM-bound elementwise; bigger tiles amortize the ~0.35us/step grid cost."""
    nt = mp // tm
    best = 1
    for g in range(1, nt + 1):
        if nt % g == 0 and tm * g <= cap:
            best = g
    return tm * best


# -----------------------------------------------------------------------------
# Forward wrapper
# -----------------------------------------------------------------------------
def residual_block_forward(x_nhwc, params, *, stride=1, change_size=True,
                           tm_matmul=512, tm_elementwise=2048,
                           vmem_budget_bytes=12 * 1024 * 1024):
    n, h, w, cin = x_nhwc.shape
    cout = params["conv1_w"].shape[0]
    cp = _round_up(cout, LANE)

    ho = (h + 2 - 3) // stride + 1
    wo = (w + 2 - 3) // stride + 1
    m = n * ho * wo

    k1p = _round_up(9 * cin, LANE)
    k2p = _round_up(9 * cout, LANE)
    kmax = max(k1p, k2p, _round_up(cin, LANE) if change_size else 0)
    tm = _pick_tm_matmul(m, kmax, cp, tm_matmul, vmem_budget_bytes)
    mp = _round_up(m, tm)                    # shared row padding for every (M, *) matrix
    tm2 = _pick_tm_elementwise(mp, tm, tm_elementwise)

    # ---------------- conv1 -> bn1 -> relu ----------------
    # NOTE: conv biases are intentionally dropped -- BatchNorm cancels them exactly.
    # TODO(synk): fuse im2col into the pass-1 kernel to kill the ~9x HBM read
    #             amplification of the materialized patch matrix.
    p1, _ = im2col(x_nhwc, 3, stride, 1)
    a1 = _pad2(p1, mp, k1p, jnp.bfloat16)
    w1 = _pad2(_w2d(params["conv1_w"]), k1p, cp, jnp.bfloat16)
    y1, s1, ss1 = conv_stats(a1, w1, tm)
    sc1, sh1 = _bn_scale_shift(s1, ss1, _pad_vec(params["bn1_g"], cp),
                               _pad_vec(params["bn1_b"], cp), m)
    # bf16 output: y1n is only ever consumed as the bf16 LHS of conv2's matmul.
    y1n = bn_act(y1, sc1, sh1, tm2, relu=True, out_dtype=jnp.bfloat16)

    # ---------------- residual path ----------------
    if change_size:
        xs = x_nhwc[:, ::stride, ::stride, :]            # 1x1 conv with stride
        pr = xs.reshape(m, cin)
        krp = _round_up(cin, LANE)
        ar = _pad2(pr, mp, krp, jnp.bfloat16)
        wr = _pad2(_w2d(params["res_w"]), krp, cp, jnp.bfloat16)
        yr, sr, ssr = conv_stats(ar, wr, tm)
        scr, shr = _bn_scale_shift(sr, ssr, _pad_vec(params["bnr_g"], cp),
                                   _pad_vec(params["bnr_b"], cp), m)
    else:
        assert stride == 1 and cin == cout, \
            "identity residual path requires stride == 1 and cin == cout"
        r_id = _pad2(x_nhwc.reshape(m, cin), mp, cp, jnp.bfloat16)

    # ---------------- conv2 -> bn2 -> (+residual) -> relu ----------------
    y1_nhwc = y1n[:m, :cout].reshape(n, ho, wo, cout)
    p2, _ = im2col(y1_nhwc, 3, 1, 1)
    a2 = _pad2(p2, mp, k2p, jnp.bfloat16)
    w2 = _pad2(_w2d(params["conv2_w"]), k2p, cp, jnp.bfloat16)
    y2, s2, ss2 = conv_stats(a2, w2, tm)
    sc2, sh2 = _bn_scale_shift(s2, ss2, _pad_vec(params["bn2_g"], cp),
                               _pad_vec(params["bn2_b"], cp), m)

    if change_size:
        out = bn_add_relu(y2, sc2, sh2, yr, scr, shr, tm2)
    else:
        out = bn_add_identity_relu(y2, sc2, sh2, r_id, tm2)
    return out[:m, :cout].reshape(n, ho, wo, cout)


# -----------------------------------------------------------------------------
# Pure-JAX reference (f32, includes the conv biases, which BN cancels)
# -----------------------------------------------------------------------------
def _conv_ref(x, w, b, stride, pad):
    y = jax.lax.conv_general_dilated(
        x, jnp.transpose(w, (2, 3, 1, 0)),
        window_strides=(stride, stride), padding=((pad, pad), (pad, pad)),
        dimension_numbers=("NHWC", "HWIO", "NHWC"))
    return y + b


def _bn_ref(y, g, b):
    mean = jnp.mean(y, axis=(0, 1, 2), keepdims=True)
    var = jnp.mean(jnp.square(y - mean), axis=(0, 1, 2), keepdims=True)
    return (y - mean) * jax.lax.rsqrt(var + EPS) * g + b


def reference_forward(x_nhwc, p, *, stride, change_size):
    if change_size:
        identity = _bn_ref(_conv_ref(x_nhwc, p["res_w"], p["res_b"], stride, 0),
                           p["bnr_g"], p["bnr_b"])
    else:
        identity = x_nhwc
    y = jax.nn.relu(_bn_ref(_conv_ref(x_nhwc, p["conv1_w"], p["conv1_b"], stride, 1),
                            p["bn1_g"], p["bn1_b"]))
    y = _bn_ref(_conv_ref(y, p["conv2_w"], p["conv2_b"], 1, 1), p["bn2_g"], p["bn2_b"])
    return jax.nn.relu(y + identity)


# -----------------------------------------------------------------------------
if __name__ == "__main__":
    key = jax.random.PRNGKey(0)

    def make_params(k, cin, cout, change_size):
        ks = jax.random.split(k, 10)
        p = {
            "conv1_w": 0.1 * jax.random.normal(ks[0], (cout, cin, 3, 3), jnp.float32),
            "conv1_b": 0.1 * jax.random.normal(ks[1], (cout,), jnp.float32),
            "bn1_g": 1.0 + 0.1 * jax.random.normal(ks[2], (cout,), jnp.float32),
            "bn1_b": 0.1 * jax.random.normal(ks[3], (cout,), jnp.float32),
            "conv2_w": 0.1 * jax.random.normal(ks[4], (cout, cout, 3, 3), jnp.float32),
            "conv2_b": 0.1 * jax.random.normal(ks[5], (cout,), jnp.float32),
            "bn2_g": 1.0 + 0.1 * jax.random.normal(ks[6], (cout,), jnp.float32),
            "bn2_b": 0.1 * jax.random.normal(ks[7], (cout,), jnp.float32),
        }
        if change_size:
            p["res_w"] = 0.1 * jax.random.normal(ks[8], (cout, cin, 1, 1), jnp.float32)
            p["res_b"] = 0.1 * jax.random.normal(ks[9], (cout,), jnp.float32)
            p["bnr_g"] = jnp.ones((cout,), jnp.float32)
            p["bnr_b"] = jnp.zeros((cout,), jnp.float32)
        return p

    k1, k2, kx1, kx2 = jax.random.split(key, 4)

    # bf16 MXU inputs + bf16 intermediate activations vs the f32 reference:
    # ~1e-2-level differences are expected; tolerance chosen accordingly.
    TOL = 4e-2

    # Test 1: residual_block(4, 8, stride=2, change_size=True); NCHW input (2,4,16,16).
    params1 = make_params(k1, 4, 8, True)
    x1 = jnp.transpose(jax.random.normal(kx1, (2, 4, 16, 16), jnp.float32),
                       (0, 2, 3, 1))
    out1 = jax.block_until_ready(
        residual_block_forward(x1, params1, stride=2, change_size=True))
    ref1 = reference_forward(x1, params1, stride=2, change_size=True)
    np.testing.assert_allclose(np.asarray(out1), np.asarray(ref1),
                               atol=TOL, rtol=TOL)

    # Test 2: identity residual path (change_size=False, stride=1, cin == cout).
    params2 = make_params(k2, 8, 8, False)
    x2 = jnp.transpose(jax.random.normal(kx2, (2, 8, 16, 16), jnp.float32),
                       (0, 2, 3, 1))
    out2 = jax.block_until_ready(
        residual_block_forward(x2, params2, stride=1, change_size=False))
    ref2 = reference_forward(x2, params2, stride=1, change_size=False)
    np.testing.assert_allclose(np.asarray(out2), np.asarray(ref2),
                               atol=TOL, rtol=TOL)

    print("KERNEL_OK")
</pallas_src>

<mosaic_0001>
module attributes {stable_mosaic.version = 11 : i64} {
  func.func @_matmul_stats_kernel(%arg0: i32, %arg1: memref<128x128xbf16, #tpu.memory_space<vmem>>, %arg2: memref<128x128xbf16, #tpu.memory_space<vmem>>, %arg3: memref<128x128xbf16, #tpu.memory_space<vmem>>, %arg4: memref<8x128xf32, #tpu.memory_space<vmem>>, %arg5: memref<8x128xf32, #tpu.memory_space<vmem>>) attributes {dimension_semantics = [#tpu.dimension_semantics<parallel>], iteration_bounds = array<i64: 1>, scalar_prefetch = 0 : i64, scratch_operands = 0 : i64, tpu.core_type = #tpu.core_type<tc>, window_params = [{transform_indices = @transform_0, window_bounds = array<i64: 128, 128>}, {pipeline_mode = #tpu.pipeline_mode<synchronous>, transform_indices = @transform_1, window_bounds = array<i64: 128, 128>}, {transform_indices = @transform_2, window_bounds = array<i64: 128, 128>}, {transform_indices = @transform_3, window_bounds = array<i64: 8, 128>}, {transform_indices = @transform_4, window_bounds = array<i64: 8, 128>}]} {
    %c0 = arith.constant 0 : index
    %c0_0 = arith.constant 0 : index
    %0 = vector.load %arg1[%c0, %c0_0] : memref<128x128xbf16, #tpu.memory_space<vmem>>, vector<128x128xbf16>
    %c0_1 = arith.constant 0 : index
    %c0_2 = arith.constant 0 : index
    %1 = vector.load %arg2[%c0_1, %c0_2] : memref<128x128xbf16, #tpu.memory_space<vmem>>, vector<128x128xbf16>
    %cst = arith.constant dense<0.000000e+00> : vector<128x128xf32>
    %2 = tpu.matmul %0, %1, %cst {dimension_numbers = #tpu.dot_dimension_numbers<[1], [0], [0], [1], [0, 0, 1, 1], [], []>} : vector<128x128xbf16>, vector<128x128xbf16>, vector<128x128xf32> -> vector<128x128xf32>
    %3 = arith.truncf %2 : vector<128x128xf32> to vector<128x128xbf16>
    %c0_3 = arith.constant 0 : index
    %c0_4 = arith.constant 0 : index
    %4 = vector.load %arg3[%c0_3, %c0_4] : memref<128x128xbf16, #tpu.memory_space<vmem>>, vector<128x128xbf16>
    tpu.vector_store %arg3[%c0_3, %c0_4], %3 {strides = array<i32>} : memref<128x128xbf16, #tpu.memory_space<vmem>>, vector<128x128xbf16>,
    %cst_5 = arith.constant dense<0.000000e+00> : vector<128xf32>
    %5 = vector.multi_reduction <add>, %2, %cst_5 [0] : vector<128x128xf32> to vector<128xf32>
    %6 = vector.shape_cast %5 : vector<128xf32> to vector<1x128xf32>
    %7 = arith.mulf %2, %2 : vector<128x128xf32>
    %cst_6 = arith.constant dense<0.000000e+00> : vector<128xf32>
    %8 = vector.multi_reduction <add>, %7, %cst_6 [0] : vector<128x128xf32> to vector<128xf32>
    %9 = vector.shape_cast %8 : vector<128xf32> to vector<1x128xf32>
    %10 = vector.shape_cast %6 : vector<1x128xf32> to vector<1x128xf32>
    %11 = vector.broadcast %10 : vector<1x128xf32> to vector<8x128xf32>
    %c0_7 = arith.constant 0 : index
    %c0_8 = arith.constant 0 : index
    %12 = vector.load %arg4[%c0_7, %c0_8] : memref<8x128xf32, #tpu.memory_space<vmem>>, vector<8x128xf32>
    tpu.vector_store %arg4[%c0_7, %c0_8], %11 {strides = array<i32>} : memref<8x128xf32, #tpu.memory_space<vmem>>, vector<8x128xf32>,
    %13 = vector.shape_cast %9 : vector<1x128xf32> to vector<1x128xf32>
    %14 = vector.broadcast %13 : vector<1x128xf32> to vector<8x128xf32>
    %c0_9 = arith.constant 0 : index
    %c0_10 = arith.constant 0 : index
    %15 = vector.load %arg5[%c0_9, %c0_10] : memref<8x128xf32, #tpu.memory_space<vmem>>, vector<8x128xf32>
    tpu.vector_store %arg5[%c0_9, %c0_10], %14 {strides = array<i32>} : memref<8x128xf32, #tpu.memory_space<vmem>>, vector<8x128xf32>,
    return
  }
  func.func @transform_0(%arg0: i32) -> (i32, i32) {
    %c0_i32 = arith.constant 0 : i32
    %c0_i32_0 = arith.constant 0 : i32
    return %arg0, %c0_i32 : i32, i32
  }
  func.func @transform_1(%arg0: i32) -> (i32, i32) {
    %c0_i32 = arith.constant 0 : i32
    %c0_i32_0 = arith.constant 0 : i32
    %c0_i32_1 = arith.constant 0 : i32
    return %c0_i32, %c0_i32_0 : i32, i32
  }
  func.func @transform_2(%arg0: i32) -> (i32, i32) {
    %c0_i32 = arith.constant 0 : i32
    %c0_i32_0 = arith.constant 0 : i32
    return %arg0, %c0_i32 : i32, i32
  }
  func.func @transform_3(%arg0: i32) -> (i32, i32) {
    %c0_i32 = arith.constant 0 : i32
    %c0_i32_0 = arith.constant 0 : i32
    return %arg0, %c0_i32 : i32, i32
  }
  func.func @transform_4(%arg0: i32) -> (i32, i32) {
    %c0_i32 = arith.constant 0 : i32
    %c0_i32_0 = arith.constant 0 : i32
    return %arg0, %c0_i32 : i32, i32
  }
}

</mosaic_0001>

<bundles_post_ra>
// kernel: tpu_custom_call.1
= control target key start
LH: loop header
LB: loop body
LE: loop exit
PB: predicated region body
PF: predicated region fallthrough
CT: control target
= control target key end

     0   :  { %10 = vsyncpa [#allocation3], 0  ;;  %s722_s0 = inlined_call_operand.hbm [shape: bf16[128,128], index: 0, kind: input, shape index: {}]   ;;  %s723_s1 = inlined_call_operand.hbm [shape: bf16[128,128], index: 1, kind: input, shape index: {}]   ;;  %s724_s2 = inlined_call_operand.hbm [shape: bf16[128,128], index: 2, kind: output, shape index: {0}]   ;;  %s725_s3 = inlined_call_operand.hbm [shape: f32[8,128], index: 3, kind: output, shape index: {1}]   ;;  %s726_s4 = inlined_call_operand.hbm [shape: f32[8,128], index: 4, kind: output, shape index: {2}]  }
   0x1   :  { %11 = vsyncpa [#allocation6], 0 }
   0x2   :  { %12 = vsyncpa [#allocation4], 0 }
   0x3   :  { %13 = vsyncpa [#allocation9], 0  ;;  %s18_s17 = sshll.u32 %s722_s0, 4  ;;  %s654_s18 = smov [#allocation2]   ;;  %s19_s17 = int_to_ptr.hbm [resolvable:$true] %s18_s17 }
   0x4   :  { %s20_s19 = sshll.u32 %s654_s18, 4  ;;  %s31_s22 = sshll.u32 %s723_s1, 4  ;;  %s21_s19 = int_to_ptr.vmem [resolvable:$true] %s20_s19  ;;  %s32_s22 = int_to_ptr.hbm [resolvable:$true] %s31_s22 }
   0x5   :  { %s655_s23 = smov 64   ;;  %s656_s24 = smov 4  }
   0x6   :  { %26 = dma.hbm_to_vmem [thread:$0]  %s19_s17, 1024, %s21_s19, [#allocation3], %s655_s23, %s655_s23, %s656_s24  }
   0x7   :  { %s657_s25 = smov [#allocation5]  }
   0x8   :  { %s33_s26 = sshll.u32 %s657_s25, 4  ;;  %s34_s26 = int_to_ptr.vmem [resolvable:$true] %s33_s26 }
   0x9   :  { %39 = dma.hbm_to_vmem [thread:$0]  %s32_s22, 1024, %s34_s26, [#allocation6], %s655_s23, %s655_s23, %s656_s24  }
   0xa   :  { %646 = dma.done.wait [#allocation3], 1024  }
   0xb   :  { %647 = vsyncadd [#allocation3], 4294966272 }
   0xc   :  { %648 = dma.done.wait [#allocation6], 1024  }
   0xd   :  { %649 = vsyncadd [#allocation6], 4294966272  ;;  %v447_v0 = vld [vmem:[#allocation5 + $0x38] sm:$0xff]  ;;  %v446_v1 = vld [vmem:[#allocation5 + $0x30] sm:$0xff]  ;;  %s658_s0 = smov [#allocation7]   ;;  %s323_s29 = sshll.u32 %s724_s2, 4  ;;  %s324_s29 = int_to_ptr.hbm [resolvable:$true] %s323_s29 }
   0xe   :  { %176 = vmatpush.bf16.msra.mxu0 %v447_v0  ;;  %495 = vmatpush.bf16.msra.mxu1 %v447_v0  ;;  %v445_v2 = vld [vmem:[#allocation5 + $0x28] sm:$0xff]  ;;  %v444_v3 = vld [vmem:[#allocation5 + $0x20] sm:$0xff]  ;;  %v443_v4 = vld [vmem:[#allocation5 + $0x18] sm:$0xff]  ;;  %s321_s1 = sshll.u32 %s658_s0, 4  ;;  %s659_s2 = smov [#allocation8]   ;;  %s322_s1 = int_to_ptr.vmem [resolvable:$true] %s321_s1 }
   0xf   :  { %496 = vmatpush.bf16.msra.mxu2 %v447_v0  ;;  %497 = vmatpush.bf16.msra.mxu3 %v447_v0  ;;  %v442_v5 = vld [vmem:[#allocation5 + $0x10] sm:$0xff]  ;;  %v441_v6 = vld [vmem:[#allocation5 + $0x8] sm:$0xff]  ;;  %v440_v7 = vld [vmem:[#allocation5] sm:$0xff]  ;;  %s335_s30 = sshll.u32 %s659_s2, 4  ;;  %s337_s7 = sshll.u32 %s725_s3, 4  ;;  %s336_s30 = int_to_ptr.vmem [resolvable:$true] %s335_s30  ;;  %s338_s7 = int_to_ptr.hbm [resolvable:$true] %s337_s7 }
  0x10   :  { %v432_v8 = vld [vmem:[#allocation2] sm:$0xff]  ;;  %v434_v9 = vld [vmem:[#allocation2 + $0x10] sm:$0xff]  ;;  %v433_v12 = vld [vmem:[#allocation2 + $0x8] sm:$0xff]  ;;  %s660_s8 = smov [#allocation10]   ;;  %s348_s12 = sshll.u32 %s726_s4, 4  ;;  %s349_s12 = int_to_ptr.hbm [resolvable:$true] %s348_s12 }
  0x11   :  { %v436_v10 = vld [vmem:[#allocation2 + $0x20] sm:$0xff]  ;;  %v438_v11 = vld [vmem:[#allocation2 + $0x30] sm:$0xff]  ;;  %v435_v13 = vld [vmem:[#allocation2 + $0x18] sm:$0xff]  ;;  %s346_s9 = sshll.u32 %s660_s8, 4  ;;  %s347_s9 = int_to_ptr.vmem [resolvable:$true] %s346_s9 }
  0x12   :  { %177 = vmatpush.bf16.msra.mxu0 %v446_v1  ;;  %498 = vmatpush.bf16.msra.mxu1 %v446_v1  ;;  %v437_v14 = vld [vmem:[#allocation2 + $0x28] sm:$0xff]  ;;  %v439_v15 = vld [vmem:[#allocation2 + $0x38] sm:$0xff] }
  0x13   :  { %499 = vmatpush.bf16.msra.mxu2 %v446_v1  ;;  %500 = vmatpush.bf16.msra.mxu3 %v446_v1 }
  0x16   :  { %178 = vmatpush.bf16.msra.mxu0 %v445_v2  ;;  %501 = vmatpush.bf16.msra.mxu1 %v445_v2 }
  0x17   :  { %502 = vmatpush.bf16.msra.mxu2 %v445_v2  ;;  %503 = vmatpush.bf16.msra.mxu3 %v445_v2 }
  0x1a   :  { %179 = vmatpush.bf16.msra.mxu0 %v444_v3  ;;  %504 = vmatpush.bf16.msra.mxu1 %v444_v3 }
  0x1b   :  { %505 = vmatpush.bf16.msra.mxu2 %v444_v3  ;;  %506 = vmatpush.bf16.msra.mxu3 %v444_v3 }
  0x1e   :  { %180 = vmatpush.bf16.msra.mxu0 %v443_v4  ;;  %507 = vmatpush.bf16.msra.mxu1 %v443_v4 }
  0x1f   :  { %508 = vmatpush.bf16.msra.mxu2 %v443_v4  ;;  %509 = vmatpush.bf16.msra.mxu3 %v443_v4 }
  0x22   :  { %181 = vmatpush.bf16.msra.mxu0 %v442_v5  ;;  %510 = vmatpush.bf16.msra.mxu1 %v442_v5 }
  0x23   :  { %511 = vmatpush.bf16.msra.mxu2 %v442_v5  ;;  %512 = vmatpush.bf16.msra.mxu3 %v442_v5 }
  0x26   :  { %182 = vmatpush.bf16.msra.mxu0 %v441_v6  ;;  %513 = vmatpush.bf16.msra.mxu1 %v441_v6 }
  0x27   :  { %514 = vmatpush.bf16.msra.mxu2 %v441_v6  ;;  %515 = vmatpush.bf16.msra.mxu3 %v441_v6 }
  0x2a   :  { %183 = vmatpush.bf16.msra.mxu0 %v440_v7  ;;  %516 = vmatpush.bf16.msra.mxu1 %v440_v7 }
  0x2b   :  { %517 = vmatpush.bf16.msra.mxu2 %v440_v7  ;;  %518 = vmatpush.bf16.msra.mxu3 %v440_v7 }
  0x2d   :  { %184 = vmatmul.bf16.vlgmr.msra.gmra.mxu0 %v432_v8  ;;  %194 = vmatmul.bf16.vlgmr.msra.gmra.mxu1 %v434_v9 }
  0x2e   :  { %204 = vmatmul.bf16.vlgmr.msra.gmra.mxu2 %v436_v10  ;;  %214 = vmatmul.bf16.vlgmr.msra.gmra.mxu3 %v438_v11 }
  0x3d   :  { %189 = vmatmul.bf16.gmra.mxu0 %v433_v12  ;;  %199 = vmatmul.bf16.gmra.mxu1 %v435_v13 }
  0x3e   :  { %209 = vmatmul.bf16.gmra.mxu2 %v437_v14  ;;  %219 = vmatmul.bf16.gmra.mxu3 %v439_v15 }
  0xaa   :  { %v185_v16 = vpop.f32.mrf.mxu0  ;;  %v195_v17 = vpop.f32.mrf.mxu1 }
  0xab   :  { %v278_v31 = vmul.f32 %v185_v16, %v185_v16  ;;  %v282_v45 = vmul.f32 %v195_v17, %v195_v17 }
  0xb1   :  { %v205_v18 = vpop.f32.mrf.mxu2  ;;  %v698_v19 = vpop.f32.mrf.mxu3 }
  0xb2   :  { %v187_v20 = vpop.f32.mrf.mxu0  ;;  %v197_v21 = vpop.f32.mrf.mxu1  ;;  %v286_v61 = vmul.f32 %v205_v18, %v205_v18  ;;  %v290_v9 = vmul.f32 %v698_v19, %v698_v19 }
  0xb3   :  { %v451_v22 = vpack.c.bf16 %v187_v20, %v185_v16  ;;  %v461_v23 = vpack.c.bf16 %v197_v21, %v195_v17  ;;  %v279_v30 = vmul.f32 %v187_v20, %v187_v20  ;;  %v257_v33 = vadd.f32 %v187_v20, %v185_v16 }
  0xb4   :  { %v283_v48 = vmul.f32 %v197_v21, %v197_v21 }
  0xb5   :  { %452 = vst [vmem:[#allocation7] sm:$0xff] %v451_v22   ;;  %v294_v34 = vadd.f32 %v279_v30, %v278_v31 }
  0xb6   :  { %489 = vst [vmem:[#allocation7 + $0x10] sm:$0xff] %v461_v23  }
  0xb9   :  { %v207_v24 = vpop.f32.mrf.mxu2  ;;  %v700_v25 = vpop.f32.mrf.mxu3 }
  0xba   :  { %v190_v26 = vpop.f32.mrf.mxu0  ;;  %v200_v27 = vpop.f32.mrf.mxu1  ;;  %v471_v28 = vpack.c.bf16 %v207_v24, %v205_v18  ;;  %v481_v29 = vpack.c.bf16 %v700_v25, %v698_v19  ;;  %v287_v0 = vmul.f32 %v207_v24, %v207_v24  ;;  %v291_v12 = vmul.f32 %v700_v25, %v700_v25 }
  0xbb   :  { %v280_v32 = vmul.f32 %v190_v26, %v190_v26  ;;  %v258_v35 = vadd.f32 %v257_v33, %v190_v26  ;;  %v284_v51 = vmul.f32 %v200_v27, %v200_v27 }
  0xbc   :  { %491 = vst [vmem:[#allocation7 + $0x20] sm:$0xff] %v471_v28  }
  0xbd   :  { %493 = vst [vmem:[#allocation7 + $0x30] sm:$0xff] %v481_v29   ;;  %v295_v38 = vadd.f32 %v294_v34, %v280_v32 }
  0xc1   :  { %v210_v36 = vpop.f32.mrf.mxu2  ;;  %v220_v37 = vpop.f32.mrf.mxu3 }
  0xc2   :  { %v192_v39 = vpop.f32.mrf.mxu0  ;;  %v202_v40 = vpop.f32.mrf.mxu1  ;;  %v288_v4 = vmul.f32 %v210_v36, %v210_v36  ;;  %v292_v16 = vmul.f32 %v220_v37, %v220_v37 }
  0xc3   :  { %v456_v41 = vpack.c.bf16 %v192_v39, %v190_v26  ;;  %v259_v42 = vadd.f32 %v258_v35, %v192_v39  ;;  %v281_v43 = vmul.f32 %v192_v39, %v192_v39  ;;  %v466_v44 = vpack.c.bf16 %v202_v40, %v200_v27 }
  0xc4   :  { %v285_v59 = vmul.f32 %v202_v40, %v202_v40 }
  0xc5   :  { %488 = vst [vmem:[#allocation7 + $0x8] sm:$0xff] %v456_v41   ;;  %v260_v46 = vadd.f32 %v259_v42, %v195_v17  ;;  %v296_v47 = vadd.f32 %v295_v38, %v281_v43 }
  0xc6   :  { %490 = vst [vmem:[#allocation7 + $0x18] sm:$0xff] %v466_v44  }
  0xc7   :  { %v297_v49 = vadd.f32 %v296_v47, %v282_v45  ;;  %v261_v50 = vadd.f32 %v260_v46, %v197_v21 }
  0xc9   :  { %v262_v52 = vadd.f32 %v261_v50, %v200_v27  ;;  %v298_v53 = vadd.f32 %v297_v49, %v283_v48  ;;  %v212_v54 = vpop.f32.mrf.mxu2  ;;  %v222_v55 = vpop.f32.mrf.mxu3 }
  0xca   :  { %v476_v56 = vpack.c.bf16 %v212_v54, %v210_v36  ;;  %v486_v57 = vpack.c.bf16 %v222_v55, %v220_v37  ;;  %v289_v8 = vmul.f32 %v212_v54, %v212_v54  ;;  %v293_v21 = vmul.f32 %v222_v55, %v222_v55 }
  0xcb   :  { %v263_v58 = vadd.f32 %v262_v52, %v202_v40  ;;  %v299_v60 = vadd.f32 %v298_v53, %v284_v51 }
  0xcc   :  { %492 = vst [vmem:[#allocation7 + $0x28] sm:$0xff] %v476_v56  }
  0xcd   :  { %v264_v62 = vadd.f32 %v263_v58, %v205_v18  ;;  %v300_v63 = vadd.f32 %v299_v60, %v285_v59  ;;  %494 = vst [vmem:[#allocation7 + $0x38] sm:$0xff] %v486_v57  }
  0xce   :  { %329 = dma.vmem_to_hbm [thread:$0]  %s322_s1, 1024, %s324_s29, [#allocation4], %s655_s23, %s655_s23, %s656_s24  }
  0xcf   :  { %v301_v1 = vadd.f32 %v300_v63, %v286_v61  ;;  %v265_v2 = vadd.f32 %v264_v62, %v207_v24 }
  0xd1   :  { %v266_v3 = vadd.f32 %v265_v2, %v210_v36  ;;  %v302_v5 = vadd.f32 %v301_v1, %v287_v0 }
  0xd3   :  { %v303_v6 = vadd.f32 %v302_v5, %v288_v4  ;;  %v267_v7 = vadd.f32 %v266_v3, %v212_v54 }
  0xd5   :  { %v268_v10 = vadd.f32 %v267_v7, %v698_v19  ;;  %v304_v11 = vadd.f32 %v303_v6, %v289_v8 }
  0xd7   :  { %v305_v13 = vadd.f32 %v304_v11, %v290_v9  ;;  %v269_v14 = vadd.f32 %v268_v10, %v700_v25 }
  0xd9   :  { %v270_v15 = vadd.f32 %v269_v14, %v220_v37  ;;  %v306_v17 = vadd.f32 %v305_v13, %v291_v12 }
  0xdb   :  { %v307_v18 = vadd.f32 %v306_v17, %v292_v16  ;;  %v271_v20 = vadd.f32 %v270_v15, %v222_v55 }
  0xdd   :  { %v272_v22 = vrot.slane %v271_v20, 4  ;;  %v308_v23 = vadd.f32 %v307_v18, %v293_v21 }
  0xdf   :  { %v273_v24 = vadd.f32 %v272_v22, %v271_v20  ;;  %v309_v26 = vrot.slane %v308_v23, 4 }
  0xe1   :  { %v274_v27 = vrot.slane %v273_v24, 2  ;;  %v310_v28 = vadd.f32 %v309_v26, %v308_v23 }
  0xe3   :  { %v275_v19 = vadd.f32 %v274_v27, %v273_v24  ;;  %v311_v29 = vrot.slane %v310_v28, 2 }
  0xe5   :  { %v312_v25 = vadd.f32 %v311_v29, %v310_v28  ;;  %v276_v30 = vrot.slane %v275_v19, 1 }
  0xe7   :  { %v277_v31 = vadd.f32 %v276_v30, %v275_v19  ;;  %v313_v32 = vrot.slane %v312_v25, 1 }
  0xe9   :  { %315 = vst [vmem:[#allocation8] sm:$0xff] %v277_v31  ;;  %v314_v33 = vadd.f32 %v313_v32, %v312_v25 }
  0xea   :  { %340 = dma.vmem_to_hbm [thread:$0]  %s336_s30, 128, %s338_s7, [#allocation9]  }
  0xeb   :  { %316 = vst [vmem:[#allocation10] sm:$0xff] %v314_v33 }
  0xec   :  { %351 = dma.vmem_to_hbm [thread:$0]  %s347_s9, 128, %s349_s12, [#allocation9]  }
  0xed   :  { %650 = dma.done.wait [#allocation4], 1024  }
  0xee   :  { %651 = vsyncadd [#allocation4], 4294966272 }
  0xef   :  { %652 = dma.done.wait [#allocation9], 256  }
  0xf0   :  { %653 = vsyncadd [#allocation9], 4294967040 }
  0xf1   :  { %364 = vsyncpa [#allocation3], 1 }
  0xf2   :  { %365 = vsyncpa [#allocation6], 1 }
  0xf3   :  { %366 = vsyncpa [#allocation4], 1 }
  0xf4   :  { %367 = vsyncpa [#allocation9], 1 }

</bundles_post_ra>
